<compile_context>
chip_gen: v7x
topology: tpu7x:2x2x1
jax: 0.10.0
libtpu: 0.0.40
codegen_flags: <defaults>
</compile_context>

<pallas_src>
import math

import jax
import jax.numpy as jnp
from jax.experimental import pallas as pl
from jax.experimental.pallas import tpu as pltpu

LN_EPS = 1e-5
INV_SQRT2 = 1.0 / math.sqrt(2.0)

# Conservative cap vs v7x's 32 MiB default scoped VMEM (64 MiB physical),
# counting double-buffered weight DMA.  Beyond this, do NOT scale the kron —
# revert to the blocked per-batch formulation described above.
_MAX_FOLDED_WEIGHT_BYTES = 8 << 20


def token_mixing_kernel(x_ref, lnw_ref, lnb_ref, k1_ref, b1_ref, k2_ref,
                        b2_ref, out_ref):
    # x_ref: (bblk, T*C) — one flattened (tokens x channels) row per batch,
    # lane-dense (T*C is a multiple of 128).
    x = x_ref[...]                                           # (bblk, TC) f32
    inv_n = 1.0 / x.shape[-1]

    # --- LayerNorm over [n_tokens, n_channel] == the whole flattened row ---
    # Two-pass (centered) variance: robust to large input offsets; the extra
    # lane reduction is free under the DMA/launch latency of this kernel.
    mean = jnp.sum(x, axis=-1, keepdims=True) * inv_n                # (bblk, 1)
    xc = x - mean
    var = jnp.sum(xc * xc, axis=-1, keepdims=True) * inv_n
    z = xc * jax.lax.rsqrt(var + LN_EPS) * lnw_ref[...] + lnb_ref[...]

    # --- mlp1: Linear(T -> H) on the permuted (C, T) view, expressed as a
    #     lane-dense matmul with the channel identity folded into the weight:
    #     h_flat[b, h*C + c] = sum_t z_flat[b, t*C + c] * W1[h, t] + b1[h]
    h = jnp.dot(z, k1_ref[...],
                preferred_element_type=jnp.float32) + b1_ref[...]    # (bblk, HC)

    # --- exact (erf-based) GELU, matching nn.GELU() default ---
    h = 0.5 * h * (1.0 + jax.lax.erf(h * INV_SQRT2))

    # --- mlp2: Linear(H -> T), same folding ---
    y = jnp.dot(h, k2_ref[...],
                preferred_element_type=jnp.float32) + b2_ref[...]    # (bblk, TC)

    # --- residual add; output already lane-dense in the (B, T*C) layout ---
    out_ref[...] = x + y


def fold_token_mixing_params(ln_w, ln_b, w1, b1, w2, b2):
    """One-time (init-time) weight preprocessing.

    Folds the channel identity into the token-mixing weights so the kernel
    never transposes and every load/store is lane-dense.  Call ONCE at module
    setup and reuse the result every forward — re-running the kron per call
    costs more than the kernel itself at these sizes.
    """
    T, C = ln_w.shape
    H = w1.shape[0]
    eye_c = jnp.eye(C, dtype=w1.dtype)
    folded = {
        "lnw": ln_w.reshape(1, T * C),
        "lnb": ln_b.reshape(1, T * C),
        "k1t": jnp.kron(w1.T, eye_c),                  # (TC, HC)
        "b1f": jnp.repeat(b1, C).reshape(1, H * C),    # b1 broadcast per channel
        "k2t": jnp.kron(w2.T, eye_c),                  # (HC, TC)
        "b2f": jnp.repeat(b2, C).reshape(1, T * C),
    }
    # Materialize now so the per-call path never re-executes these XLA ops.
    return jax.tree_util.tree_map(jax.block_until_ready, folded)


@jax.jit
def token_mixing_mlp(x, folded):
    """x: (B, T, C); folded: output of fold_token_mixing_params (cached)."""
    B, T, C = x.shape
    TC = T * C
    HC = folded["k1t"].shape[1]

    weight_bytes = (folded["k1t"].size + folded["k2t"].size) * 4
    # 2x for double-buffered weight DMA.  If this trips, the kron formulation
    # is the wrong structure — use blocked per-batch W @ z matmuls instead.
    assert 2 * weight_bytes <= _MAX_FOLDED_WEIGHT_BYTES, (
        "kron-folded weights too large; switch to the blocked per-batch "
        "formulation (parallel batch axis, K reduction axis last)")
    # TODO(synk): implement the blocked per-batch path for real Mixer sizes.

    # Batch tiling: whole batch in one step for small B (per-step overhead
    # ~0.35 us dominates); split onto a "parallel" grid axis for larger B so
    # both v7x TensorCores are used.
    bblk = 8 if (B > 8 and B % 8 == 0) else B
    nb = B // bblk

    x_flat = x.reshape(B, TC)                      # free row-major reshape

    cost = pl.CostEstimate(
        flops=4 * B * TC * HC + 10 * B * TC,       # two matmuls + LN/GELU elementwise
        transcendentals=B * HC + B,                # erf per hidden elem + rsqrt
        bytes_accessed=4 * (2 * B * TC + TC * HC + HC * TC + 3 * TC + HC),
    )

    out_flat = pl.pallas_call(
        token_mixing_kernel,
        out_shape=jax.ShapeDtypeStruct((B, TC), x.dtype),
        grid=(nb,),
        in_specs=[
            pl.BlockSpec((bblk, TC), lambda i: (i, 0)),   # X (flattened)
            pl.BlockSpec((1, TC), lambda i: (0, 0)),      # LN weight
            pl.BlockSpec((1, TC), lambda i: (0, 0)),      # LN bias
            pl.BlockSpec((TC, HC), lambda i: (0, 0)),     # kron(W1^T, I_C)
            pl.BlockSpec((1, HC), lambda i: (0, 0)),      # b1 (repeated)
            pl.BlockSpec((HC, TC), lambda i: (0, 0)),     # kron(W2^T, I_C)
            pl.BlockSpec((1, TC), lambda i: (0, 0)),      # b2 (repeated)
        ],
        out_specs=pl.BlockSpec((bblk, TC), lambda i: (i, 0)),
        input_output_aliases={0: 0},               # reuse x_flat's HBM buffer
        cost_estimate=cost,
        compiler_params=pltpu.CompilerParams(
            dimension_semantics=("parallel",)),
    )(x_flat, folded["lnw"], folded["lnb"], folded["k1t"], folded["b1f"],
      folded["k2t"], folded["b2f"])

    return out_flat.reshape(B, T, C)


def reference_jax(x, ln_w, ln_b, w1, b1, w2, b2):
    """Pure-JAX reference mirroring the PyTorch forward."""
    mean = jnp.mean(x, axis=(1, 2), keepdims=True)
    var = jnp.mean((x - mean) ** 2, axis=(1, 2), keepdims=True)
    z = (x - mean) / jnp.sqrt(var + LN_EPS) * ln_w + ln_b
    z = jnp.transpose(z, (0, 2, 1))                       # (B, C, T)
    h = jnp.einsum('bct,ht->bch', z, w1) + b1
    h = 0.5 * h * (1.0 + jax.lax.erf(h / jnp.sqrt(2.0)))  # exact GELU
    y = jnp.einsum('bch,th->bct', h, w2) + b2
    y = jnp.transpose(y, (0, 2, 1))                       # (B, T, C)
    return x + y


if __name__ == "__main__":
    B, T, C, H = 2, 16, 8, 32   # batch, n_tokens, n_channel, n_hidden

    key = jax.random.PRNGKey(0)
    kx, k1, k2, k3, k4, k5, k6 = jax.random.split(key, 7)

    x = jax.random.normal(kx, (B, T, C), dtype=jnp.float32)

    # LayerNorm params (deterministic but non-trivial).
    ln_w = jnp.ones((T, C), jnp.float32) + 0.1 * jax.random.normal(k1, (T, C), jnp.float32)
    ln_b = 0.1 * jax.random.normal(k2, (T, C), jnp.float32)

    # Linear params (PyTorch layout: weight (out, in), bias (out,))
    w1 = jax.random.normal(k3, (H, T), jnp.float32) / jnp.sqrt(T)
    b1 = 0.1 * jax.random.normal(k4, (H,), jnp.float32)
    w2 = jax.random.normal(k5, (T, H), jnp.float32) / jnp.sqrt(H)
    b2 = 0.1 * jax.random.normal(k6, (T,), jnp.float32)

    # One-time weight folding (module "init"); reused by every forward call.
    folded = fold_token_mixing_params(ln_w, ln_b, w1, b1, w2, b2)

    out = token_mixing_mlp(x, folded)
    out = jax.block_until_ready(out)

    ref = reference_jax(x, ln_w, ln_b, w1, b1, w2, b2)
    assert out.shape == (B, T, C)
    assert jnp.allclose(out, ref, atol=2e-5, rtol=1e-5), (
        f"max err {jnp.max(jnp.abs(out - ref))}")

    print("KERNEL_OK")
</pallas_src>

<mosaic_0001>
module attributes {stable_mosaic.version = 11 : i64} {
  func.func @token_mixing_kernel(%arg0: i32, %arg1: memref<2x128xf32, #tpu.memory_space<vmem>>, %arg2: memref<1x128xf32, #tpu.memory_space<vmem>>, %arg3: memref<1x128xf32, #tpu.memory_space<vmem>>, %arg4: memref<128x256xf32, #tpu.memory_space<vmem>>, %arg5: memref<1x256xf32, #tpu.memory_space<vmem>>, %arg6: memref<256x128xf32, #tpu.memory_space<vmem>>, %arg7: memref<1x128xf32, #tpu.memory_space<vmem>>, %arg8: memref<2x128xf32, #tpu.memory_space<vmem>>) attributes {dimension_semantics = [#tpu.dimension_semantics<parallel>], iteration_bounds = array<i64: 1>, scalar_prefetch = 0 : i64, scratch_operands = 0 : i64, tpu.core_type = #tpu.core_type<tc>, window_params = [{transform_indices = @transform_0, window_bounds = array<i64: 2, 128>}, {pipeline_mode = #tpu.pipeline_mode<synchronous>, transform_indices = @transform_1, window_bounds = array<i64: 1, 128>}, {pipeline_mode = #tpu.pipeline_mode<synchronous>, transform_indices = @transform_2, window_bounds = array<i64: 1, 128>}, {pipeline_mode = #tpu.pipeline_mode<synchronous>, transform_indices = @transform_3, window_bounds = array<i64: 128, 256>}, {pipeline_mode = #tpu.pipeline_mode<synchronous>, transform_indices = @transform_4, window_bounds = array<i64: 1, 256>}, {pipeline_mode = #tpu.pipeline_mode<synchronous>, transform_indices = @transform_5, window_bounds = array<i64: 256, 128>}, {pipeline_mode = #tpu.pipeline_mode<synchronous>, transform_indices = @transform_6, window_bounds = array<i64: 1, 128>}, {transform_indices = @transform_7, window_bounds = array<i64: 2, 128>}]} {
    %c0 = arith.constant 0 : index
    %c0_0 = arith.constant 0 : index
    %0 = vector.load %arg1[%c0, %c0_0] : memref<2x128xf32, #tpu.memory_space<vmem>>, vector<2x128xf32>
    %cst = arith.constant dense<0.000000e+00> : vector<2xf32>
    %1 = vector.multi_reduction <add>, %0, %cst [1] : vector<2x128xf32> to vector<2xf32>
    %2 = vector.shape_cast %1 : vector<2xf32> to vector<2x1xf32>
    %cst_1 = arith.constant 7.812500e-03 : f32
    %3 = vector.broadcast %cst_1 : f32 to vector<2x1xf32>
    %4 = arith.mulf %2, %3 : vector<2x1xf32>
    %5 = vector.broadcast %4 : vector<2x1xf32> to vector<2x128xf32>
    %6 = arith.subf %0, %5 : vector<2x128xf32>
    %7 = arith.mulf %6, %6 : vector<2x128xf32>
    %cst_2 = arith.constant dense<0.000000e+00> : vector<2xf32>
    %8 = vector.multi_reduction <add>, %7, %cst_2 [1] : vector<2x128xf32> to vector<2xf32>
    %9 = vector.shape_cast %8 : vector<2xf32> to vector<2x1xf32>
    %cst_3 = arith.constant 7.812500e-03 : f32
    %10 = vector.broadcast %cst_3 : f32 to vector<2x1xf32>
    %11 = arith.mulf %9, %10 : vector<2x1xf32>
    %cst_4 = arith.constant 9.99999974E-6 : f32
    %12 = vector.broadcast %cst_4 : f32 to vector<2x1xf32>
    %13 = arith.addf %11, %12 : vector<2x1xf32>
    %14 = math.rsqrt %13 : vector<2x1xf32>
    %15 = vector.broadcast %14 : vector<2x1xf32> to vector<2x128xf32>
    %16 = arith.mulf %6, %15 : vector<2x128xf32>
    %c0_5 = arith.constant 0 : index
    %c0_6 = arith.constant 0 : index
    %17 = vector.load %arg2[%c0_5, %c0_6] : memref<1x128xf32, #tpu.memory_space<vmem>>, vector<1x128xf32>
    %18 = vector.broadcast %17 : vector<1x128xf32> to vector<2x128xf32>
    %19 = arith.mulf %16, %18 : vector<2x128xf32>
    %c0_7 = arith.constant 0 : index
    %c0_8 = arith.constant 0 : index
    %20 = vector.load %arg3[%c0_7, %c0_8] : memref<1x128xf32, #tpu.memory_space<vmem>>, vector<1x128xf32>
    %21 = vector.broadcast %20 : vector<1x128xf32> to vector<2x128xf32>
    %22 = arith.addf %19, %21 : vector<2x128xf32>
    %c0_9 = arith.constant 0 : index
    %c0_10 = arith.constant 0 : index
    %23 = vector.load %arg4[%c0_9, %c0_10] : memref<128x256xf32, #tpu.memory_space<vmem>>, vector<128x256xf32>
    %cst_11 = arith.constant dense<0.000000e+00> : vector<2x256xf32>
    %24 = tpu.matmul %22, %23, %cst_11 {dimension_numbers = #tpu.dot_dimension_numbers<[1], [0], [0], [1], [0, 0, 1, 1], [], []>} : vector<2x128xf32>, vector<128x256xf32>, vector<2x256xf32> -> vector<2x256xf32>
    %c0_12 = arith.constant 0 : index
    %c0_13 = arith.constant 0 : index
    %25 = vector.load %arg5[%c0_12, %c0_13] : memref<1x256xf32, #tpu.memory_space<vmem>>, vector<1x256xf32>
    %26 = vector.broadcast %25 : vector<1x256xf32> to vector<2x256xf32>
    %27 = arith.addf %24, %26 : vector<2x256xf32>
    %cst_14 = arith.constant 5.000000e-01 : f32
    %28 = vector.broadcast %cst_14 : f32 to vector<2x256xf32>
    %29 = arith.mulf %28, %27 : vector<2x256xf32>
    %cst_15 = arith.constant 0.707106769 : f32
    %30 = vector.broadcast %cst_15 : f32 to vector<2x256xf32>
    %31 = arith.mulf %27, %30 : vector<2x256xf32>
    %32 = math.erf %31 : vector<2x256xf32>
    %cst_16 = arith.constant 1.000000e+00 : f32
    %33 = vector.broadcast %cst_16 : f32 to vector<2x256xf32>
    %34 = arith.addf %33, %32 : vector<2x256xf32>
    %35 = arith.mulf %29, %34 : vector<2x256xf32>
    %c0_17 = arith.constant 0 : index
    %c0_18 = arith.constant 0 : index
    %36 = vector.load %arg6[%c0_17, %c0_18] : memref<256x128xf32, #tpu.memory_space<vmem>>, vector<256x128xf32>
    %cst_19 = arith.constant dense<0.000000e+00> : vector<2x128xf32>
    %37 = tpu.matmul %35, %36, %cst_19 {dimension_numbers = #tpu.dot_dimension_numbers<[1], [0], [0], [1], [0, 0, 1, 1], [], []>} : vector<2x256xf32>, vector<256x128xf32>, vector<2x128xf32> -> vector<2x128xf32>
    %c0_20 = arith.constant 0 : index
    %c0_21 = arith.constant 0 : index
    %38 = vector.load %arg7[%c0_20, %c0_21] : memref<1x128xf32, #tpu.memory_space<vmem>>, vector<1x128xf32>
    %39 = vector.broadcast %38 : vector<1x128xf32> to vector<2x128xf32>
    %40 = arith.addf %37, %39 : vector<2x128xf32>
    %41 = arith.addf %0, %40 : vector<2x128xf32>
    %c0_22 = arith.constant 0 : index
    %c0_23 = arith.constant 0 : index
    %42 = vector.load %arg8[%c0_22, %c0_23] : memref<2x128xf32, #tpu.memory_space<vmem>>, vector<2x128xf32>
    tpu.vector_store %arg8[%c0_22, %c0_23], %41 {strides = array<i32>} : memref<2x128xf32, #tpu.memory_space<vmem>>, vector<2x128xf32>,
    return
  }
  func.func @transform_0(%arg0: i32) -> (i32, i32) {
    %c0_i32 = arith.constant 0 : i32
    %c0_i32_0 = arith.constant 0 : i32
    return %arg0, %c0_i32 : i32, i32
  }
  func.func @transform_1(%arg0: i32) -> (i32, i32) {
    %c0_i32 = arith.constant 0 : i32
    %c0_i32_0 = arith.constant 0 : i32
    %c0_i32_1 = arith.constant 0 : i32
    return %c0_i32, %c0_i32_0 : i32, i32
  }
  func.func @transform_2(%arg0: i32) -> (i32, i32) {
    %c0_i32 = arith.constant 0 : i32
    %c0_i32_0 = arith.constant 0 : i32
    %c0_i32_1 = arith.constant 0 : i32
    return %c0_i32, %c0_i32_0 : i32, i32
  }
  func.func @transform_3(%arg0: i32) -> (i32, i32) {
    %c0_i32 = arith.constant 0 : i32
    %c0_i32_0 = arith.constant 0 : i32
    %c0_i32_1 = arith.constant 0 : i32
    return %c0_i32, %c0_i32_0 : i32, i32
  }
  func.func @transform_4(%arg0: i32) -> (i32, i32) {
    %c0_i32 = arith.constant 0 : i32
    %c0_i32_0 = arith.constant 0 : i32
    %c0_i32_1 = arith.constant 0 : i32
    return %c0_i32, %c0_i32_0 : i32, i32
  }
  func.func @transform_5(%arg0: i32) -> (i32, i32) {
    %c0_i32 = arith.constant 0 : i32
    %c0_i32_0 = arith.constant 0 : i32
    %c0_i32_1 = arith.constant 0 : i32
    return %c0_i32, %c0_i32_0 : i32, i32
  }
  func.func @transform_6(%arg0: i32) -> (i32, i32) {
    %c0_i32 = arith.constant 0 : i32
    %c0_i32_0 = arith.constant 0 : i32
    %c0_i32_1 = arith.constant 0 : i32
    return %c0_i32, %c0_i32_0 : i32, i32
  }
  func.func @transform_7(%arg0: i32) -> (i32, i32) {
    %c0_i32 = arith.constant 0 : i32
    %c0_i32_0 = arith.constant 0 : i32
    return %arg0, %c0_i32 : i32, i32
  }
}

</mosaic_0001>

<bundles_post_ra>
// kernel: token_mixing_mlp.1
= control target key start
LH: loop header
LB: loop body
LE: loop exit
PB: predicated region body
PF: predicated region fallthrough
CT: control target
= control target key end

     0   :  { %12 = vsyncpa [#allocation3], 0  ;;  %s591_s0 = inlined_call_operand.vmem [shape: f32[2,128], index: 0, kind: input, shape index: {}, may-alias: {0,7}]   ;;  %s592_s1 = inlined_call_operand.vmem [shape: f32[1,128], index: 1, kind: input, shape index: {}]   ;;  %s593_s2 = inlined_call_operand.vmem [shape: f32[1,128], index: 2, kind: input, shape index: {}]   ;;  %s594_s3 = inlined_call_operand.hbm [shape: f32[128,256], index: 3, kind: input, shape index: {}]   ;;  %s595_s4 = inlined_call_operand.vmem [shape: f32[1,256], index: 4, kind: input, shape index: {}]   ;;  %s596_s5 = inlined_call_operand.hbm [shape: f32[256,128], index: 5, kind: input, shape index: {}]   ;;  %s597_s6 = inlined_call_operand.vmem [shape: f32[1,128], index: 6, kind: input, shape index: {}]   ;;  %s598_s7 = inlined_call_operand.vmem [shape: f32[2,128], index: 7, kind: output, shape index: {}, may-alias: {0,7}]  }
   0x1   :  { %13 = vsyncpa [#allocation5], 0  ;;  %s490_s24 = smov [#allocation2]   ;;  %s442_s28 = scalar_lea.hbm %s594_s3, 4096 }
   0x2   :  { %s25_s25 = sshll.u32 %s490_s24, 4  ;;  %p443_p0 = scmp.ne.s32.totalorder %s594_s3, %s442_s28  ;;  %s26_s25 = int_to_ptr.vmem [resolvable:$true] %s25_s25 }
   0x3   :  { %p446_p1 = scmp.lt.u32.totalorder %s442_s28, %s594_s3 }
   0x5   :  { %p448_p2 = pnand %p446_p1, %p443_p0 }
   0x7   :  { %451 = shalt.err (!%p448_p2)
}
   0x8   :  { %s452_s10 = scalar_lea.vmem %s26_s25, 4096  ;;  %p457_p4 = scmp.lt.s32.totalorder %s26_s25, %s26_s25 }
   0x9   :  { %p453_p3 = scmp.ne.s32.totalorder %s26_s25, %s452_s10  ;;  %p458_p5 = scmp.lt.s32.totalorder %s452_s10, %s452_s10 }
   0xb   :  { %p459_p6 = por %p458_p5, %p457_p4 }
   0xd   :  { %p460_p7 = pnand %p459_p6, %p453_p3 }
   0xf   :  { %463 = shalt.err (!%p460_p7)
}
  0x10   :  { %s491_s11 = smov 256   ;;  %s492_s12 = smov 16  }
  0x11   :  { %31 = dma.hbm_to_vmem [thread:$0]  %s594_s3, 4096, %s26_s25, [#allocation3], %s491_s11, %s491_s11, %s492_s12  }
  0x12   :  { %s493_s15 = smov [#allocation4]   ;;  %s464_s19 = scalar_lea.hbm %s596_s5, 4096 }
  0x13   :  { %s39_s16 = sshll.u32 %s493_s15, 4  ;;  %p465_p8 = scmp.ne.s32.totalorder %s596_s5, %s464_s19  ;;  %s40_s16 = int_to_ptr.vmem [resolvable:$true] %s39_s16 }
  0x14   :  { %p468_p9 = scmp.lt.u32.totalorder %s464_s19, %s596_s5 }
  0x16   :  { %p470_p10 = pnand %p468_p9, %p465_p8 }
  0x18   :  { %473 = shalt.err (!%p470_p10)
}
  0x19   :  { %s474_s24 = scalar_lea.vmem %s40_s16, 4096  ;;  %p479_p12 = scmp.lt.s32.totalorder %s40_s16, %s40_s16 }
  0x1a   :  { %p475_p11 = scmp.ne.s32.totalorder %s40_s16, %s474_s24  ;;  %p480_p13 = scmp.lt.s32.totalorder %s474_s24, %s474_s24 }
  0x1c   :  { %p481_p0 = por %p480_p13, %p479_p12 }
  0x1e   :  { %p482_p1 = pnand %p481_p0, %p475_p11 }
  0x20   :  { %485 = shalt.err (!%p482_p1)
}
  0x21   :  { %s494_s3 = smov 128   ;;  %s495_s25 = smov 8  }
  0x22   :  { %45 = dma.hbm_to_vmem [thread:$0]  %s596_s5, 4096, %s40_s16, [#allocation5], %s494_s3, %s494_s3, %s495_s25  }
  0x23   :  { %486 = dma.done.wait [#allocation3], 4096  }
  0x24   :  { %487 = vsyncadd [#allocation3], 4294963200 }
  0x25   :  { %488 = dma.done.wait [#allocation5], 4096  }
  0x26   :  { %489 = vsyncadd [#allocation5], 4294963200  ;;  %vm55_vm0 = vcmask 1041408   ;;  %v564_v0 = vld [vmem:[%s591_s0] sm:$0x3]  ;;  %v86_v2 = vld [vmem:[#allocation2 + $0x8] sm:$0xff] }
  0x27   :  { %v56_v1 = vsel %vm55_vm0, %v564_v0, 0.0  ;;  %v88_v3 = vld [vmem:[#allocation2 + $0x18] sm:$0xff]  ;;  %v85_v4 = vld [vmem:[#allocation2] sm:$0xff]  ;;  %v87_v6 = vld [vmem:[#allocation2 + $0x10] sm:$0xff]  ;;  %v496_v44 = vmov 0.0  }
  0x28   :  { %57 = vadd.xlane.f32.xlu0 %v56_v1  ;;  %v365_v5 = vpack.c.bf16 %v88_v3, %v86_v2  ;;  %v90_v7 = vld [vmem:[#allocation2 + $0x28] sm:$0xff]  ;;  %v92_v8 = vld [vmem:[#allocation2 + $0x38] sm:$0xff]  ;;  %v367_v9 = vpack.c.bf16 %v87_v6, %v85_v4  ;;  %v89_v11 = vld [vmem:[#allocation2 + $0x20] sm:$0xff]  ;;  %193 = vmatprep.mubr.f32.mxu0 %v496_v44 }
  0x29   :  { %v369_v10 = vpack.c.bf16 %v92_v8, %v90_v7  ;;  %v91_v12 = vld [vmem:[#allocation2 + $0x30] sm:$0xff]  ;;  %v94_v13 = vld [vmem:[#allocation2 + $0x48] sm:$0xff]  ;;  %v96_v14 = vld [vmem:[#allocation2 + $0x58] sm:$0xff] }
  0x2a   :  { %366 = vmatprep.subr.bf16.mxu0 %v365_v5  ;;  %v371_v15 = vpack.c.bf16 %v91_v12, %v89_v11  ;;  %v373_v16 = vpack.c.bf16 %v96_v14, %v94_v13  ;;  %v93_v17 = vld [vmem:[#allocation2 + $0x40] sm:$0xff]  ;;  %v95_v18 = vld [vmem:[#allocation2 + $0x50] sm:$0xff]  ;;  %v98_v25 = vld [vmem:[#allocation2 + $0x68] sm:$0xff] }
  0x2b   :  { %368 = vmatpush1.bf16.msra.mxu0 %v367_v9  ;;  %v375_v19 = vpack.c.bf16 %v95_v18, %v93_v17  ;;  %v100_v26 = vld [vmem:[#allocation2 + $0x78] sm:$0xff]  ;;  %v97_v28 = vld [vmem:[#allocation2 + $0x60] sm:$0xff]  ;;  %v99_v29 = vld [vmem:[#allocation2 + $0x70] sm:$0xff] }
  0x2c   :  { %370 = vmatprep.subr.bf16.mxu0 %v369_v10  ;;  %v377_v27 = vpack.c.bf16 %v100_v26, %v98_v25  ;;  %v379_v30 = vpack.c.bf16 %v99_v29, %v97_v28  ;;  %v102_v31 = vld [vmem:[#allocation2 + $0x88] sm:$0xff]  ;;  %v104_v32 = vld [vmem:[#allocation2 + $0x98] sm:$0xff]  ;;  %v101_v34 = vld [vmem:[#allocation2 + $0x80] sm:$0xff] }
  0x2d   :  { %v381_v33 = vpack.c.bf16 %v104_v32, %v102_v31  ;;  %v103_v35 = vld [vmem:[#allocation2 + $0x90] sm:$0xff]  ;;  %v106_v37 = vld [vmem:[#allocation2 + $0xa8] sm:$0xff]  ;;  %v108_v38 = vld [vmem:[#allocation2 + $0xb8] sm:$0xff] }
  0x2e   :  { %v383_v36 = vpack.c.bf16 %v103_v35, %v101_v34  ;;  %v105_v39 = vld [vmem:[#allocation2 + $0xa0] sm:$0xff]  ;;  %v385_v40 = vpack.c.bf16 %v108_v38, %v106_v37  ;;  %v107_v41 = vld [vmem:[#allocation2 + $0xb0] sm:$0xff]  ;;  %v110_v42 = vld [vmem:[#allocation2 + $0xc8] sm:$0xff] }
  0x2f   :  { %372 = vmatpush1.bf16.msra.mxu0 %v371_v15  ;;  %v112_v43 = vld [vmem:[#allocation2 + $0xd8] sm:$0xff]  ;;  %v387_v45 = vpack.c.bf16 %v107_v41, %v105_v39  ;;  %v109_v47 = vld [vmem:[#allocation2 + $0xc0] sm:$0xff]  ;;  %v111_v48 = vld [vmem:[#allocation2 + $0xd0] sm:$0xff] }
  0x30   :  { %374 = vmatprep.subr.bf16.mxu0 %v373_v16  ;;  %v389_v46 = vpack.c.bf16 %v112_v43, %v110_v42  ;;  %v114_v49 = vld [vmem:[#allocation2 + $0xe8] sm:$0xff]  ;;  %v116_v50 = vld [vmem:[#allocation2 + $0xf8] sm:$0xff]  ;;  %v391_v51 = vpack.c.bf16 %v111_v48, %v109_v47  ;;  %v113_v53 = vld [vmem:[#allocation2 + $0xe0] sm:$0xff] }
  0x31   :  { %v393_v52 = vpack.c.bf16 %v116_v50, %v114_v49  ;;  %v115_v54 = vld [vmem:[#allocation2 + $0xf0] sm:$0xff]  ;;  %v226_v56 = vld [vmem:[#allocation4 + $0x80] sm:$0xff]  ;;  %v227_v57 = vld [vmem:[#allocation4 + $0x88] sm:$0xff]  ;;  %v119_v50 = vlaneseq }
  0x32   :  { %v395_v55 = vpack.c.bf16 %v115_v54, %v113_v53  ;;  %v210_v58 = vld [vmem:[#allocation4] sm:$0xff]  ;;  %v397_v59 = vpack.c.bf16 %v227_v57, %v226_v56  ;;  %v211_v60 = vld [vmem:[#allocation4 + $0x8] sm:$0xff]  ;;  %v228_v61 = vld [vmem:[#allocation4 + $0x90] sm:$0xff] }
  0x33   :  { %376 = vmatpush1.bf16.msra.mxu0 %v375_v19  ;;  %v229_v62 = vld [vmem:[#allocation4 + $0x98] sm:$0xff]  ;;  %v399_v63 = vpack.c.bf16 %v211_v60, %v210_v58  ;;  %v212_v2 = vld [vmem:[#allocation4 + $0x10] sm:$0xff]  ;;  %v230_v4 = vld [vmem:[#allocation4 + $0xa0] sm:$0xff] }
  0x34   :  { %378 = vmatprep.subr.bf16.mxu0 %v377_v27  ;;  %v401_v1 = vpack.c.bf16 %v229_v62, %v228_v61  ;;  %v213_v3 = vld [vmem:[#allocation4 + $0x18] sm:$0xff]  ;;  %398 = vmatprep.subr.bf16.mxu1 %v397_v59  ;;  %v231_v5 = vld [vmem:[#allocation4 + $0xa8] sm:$0xff]  ;;  %v214_v8 = vld [vmem:[#allocation4 + $0x20] sm:$0xff] }
  0x35   :  { %400 = vmatpush3.bf16.msra.mxu1 %v399_v63  ;;  %v403_v6 = vpack.c.bf16 %v213_v3, %v212_v2  ;;  %v405_v7 = vpack.c.bf16 %v231_v5, %v230_v4  ;;  %v215_v9 = vld [vmem:[#allocation4 + $0x28] sm:$0xff]  ;;  %v327_v15 = vld [vmem:[%s592_s1] ss:$0 sm:$0xff]  ;;  %v217_v25 = vld [vmem:[#allocation4 + $0x38] sm:$0xff] }
  0x36   :  { %402 = vmatprep.subr.bf16.mxu1 %v401_v1  ;;  %v407_v10 = vpack.c.bf16 %v215_v9, %v214_v8  ;;  %v328_v17 = vld [vmem:[%s593_s2] ss:$0 sm:$0xff]  ;;  %v235_v28 = vld [vmem:[#allocation4 + $0xc8] sm:$0xff]  ;;  %v236_v32 = vld [vmem:[#allocation4 + $0xd0] sm:$0xff] }
  0x37   :  { %380 = vmatpush1.bf16.msra.mxu0 %v379_v30  ;;  %v234_v27 = vld [vmem:[#allocation4 + $0xc0] sm:$0xff]  ;;  %v220_v35 = vld [vmem:[#allocation4 + $0x50] sm:$0xff]  ;;  %v239_v39 = vld [vmem:[#allocation4 + $0xe8] sm:$0xff] }
  0x38   :  { %382 = vmatprep.subr.bf16.mxu0 %v381_v33  ;;  %v413_v29 = vpack.c.bf16 %v235_v28, %v234_v27  ;;  %v218_v30 = vld [vmem:[#allocation4 + $0x40] sm:$0xff]  ;;  %v237_v33 = vld [vmem:[#allocation4 + $0xd8] sm:$0xff]  ;;  %v223_v42 = vld [vmem:[#allocation4 + $0x68] sm:$0xff] }
  0x39   :  { %404 = vmatpush3.bf16.msra.mxu1 %v403_v6  ;;  %v417_v34 = vpack.c.bf16 %v237_v33, %v236_v32  ;;  %v238_v38 = vld [vmem:[#allocation4 + $0xe0] sm:$0xff]  ;;  %v240_v44 = vld [vmem:[#allocation4 + $0xf0] sm:$0xff]  ;;  %v225_v48 = vld [vmem:[#allocation4 + $0x78] sm:$0xff] }
  0x3a   :  { %406 = vmatprep.subr.bf16.mxu1 %v405_v7  ;;  %v222_v41 = vld [vmem:[#allocation4 + $0x60] sm:$0xff]  ;;  %v224_v47 = vld [vmem:[#allocation4 + $0x70] sm:$0xff] }
  0x3b   :  { %384 = vmatpush1.bf16.msra.mxu0 %v383_v36  ;;  %v221_v36 = vld [vmem:[#allocation4 + $0x58] sm:$0xff]  ;;  %v423_v43 = vpack.c.bf16 %v223_v42, %v222_v41  ;;  %v427_v49 = vpack.c.bf16 %v225_v48, %v224_v47  ;;  %v117_v53 = vld [vmem:[%s595_s4] sm:$0x3] }
  0x3c   :  { %386 = vmatprep.subr.bf16.mxu0 %v385_v40  ;;  %v419_v37 = vpack.c.bf16 %v221_v36, %v220_v35  ;;  %v421_v40 = vpack.c.bf16 %v239_v39, %v238_v38  ;;  %v329_v9 = vld [vmem:[%s597_s6] ss:$0 sm:$0xff] }
  0x3d   :  { %408 = vmatpush3.bf16.msra.mxu1 %v407_v10 }
  0x3f   :  { %388 = vmatpush1.bf16.msra.mxu0 %v387_v45  ;;  %v241_v45 = vld [vmem:[#allocation4 + $0xf8] sm:$0xff] }
  0x40   :  { %390 = vmatprep.subr.bf16.mxu0 %v389_v46  ;;  %v425_v46 = vpack.c.bf16 %v241_v45, %v240_v44 }
  0x43   :  { %392 = vmatpush1.bf16.msra.mxu0 %v391_v51  ;;  %v120_v51 = vshrl.u32 %v119_v50, 7 }
  0x44   :  { %394 = vmatprep.subr.bf16.mxu0 %v393_v52 }
  0x45   :  { %v121_v52 = vsub.s32 0, %v120_v51  ;;  %v125_v54 = vsub.s32 1, %v120_v51 }
  0x47   :  { %396 = vmatpush1.bf16.msra.mxu0 %v395_v55  ;;  %v122_v55 = vrot.slane %v117_v53, %v121_v52  ;;  %v126_v56 = vrot.slane %v117_v53, %v125_v54 }
  0xb5   :  { %v58_v20 = vpop.xlane.xlu0 %57 }
  0xb6   :  { %v59_v21 = vmul.f32 0.0078125, %v58_v20  ;;  %v232_v20 = vld [vmem:[#allocation4 + $0xb0] sm:$0xff] }
  0xb8   :  { %v569_v22 = vsub.f32 %v564_v0, %v59_v21  ;;  %v233_v21 = vld [vmem:[#allocation4 + $0xb8] sm:$0xff] }
  0xba   :  { %v61_v23 = vmul.f32 %v569_v22, %v569_v22 }
  0xbc   :  { %v62_v24 = vsel %vm55_vm0, %v61_v23, 0.0  ;;  %v409_v23 = vpack.c.bf16 %v233_v21, %v232_v20 }
  0xbd   :  { %63 = vadd.xlane.f32.xlu0 %v62_v24  ;;  %v216_v24 = vld [vmem:[#allocation4 + $0x30] sm:$0xff] }
  0xbe   :  { %v411_v26 = vpack.c.bf16 %v217_v25, %v216_v24  ;;  %410 = vmatprep.subr.bf16.mxu1 %v409_v23 }
  0xc0   :  { %412 = vmatpush3.bf16.msra.mxu1 %v411_v26 }
  0xc1   :  { %414 = vmatprep.subr.bf16.mxu1 %v413_v29 }
 0x14a   :  { %v64_v11 = vpop.xlane.xlu0 %63 }
 0x14b   :  { %v65_v12 = vmul.f32 0.0078125, %v64_v11 }
 0x14d   :  { %v66_v13 = vadd.f32 1e-05, %v65_v12 }
 0x14f   :  { %436 = vrsqrt.f32 %v66_v13 }
 0x159   :  { %v437_v14 = vpop.eup %436 }
 0x15a   :  { %v68_v16 = vmul.f32 %v437_v14, %v569_v22  ;;  %v219_v22 = vld [vmem:[#allocation4 + $0x48] sm:$0xff] }
 0x15b   :  { %v415_v31 = vpack.c.bf16 %v219_v22, %v218_v30 }
 0x15c   :  { %v76_v18 = vmul.f32 %v327_v15, %v68_v16 }
 0x15d   :  { %416 = vmatpush3.bf16.msra.mxu1 %v415_v31 }
 0x15e   :  { %v84_v19 = vadd.f32 %v328_v17, %v76_v18  ;;  %418 = vmatprep.subr.bf16.mxu1 %v417_v34 }
 0x160   :  { %194 = vmatmul.mubr.f32.vlgmr.msra.gmra.mrb[0].mxu0 %v84_v19 }
 0x161   :  { %420 = vmatpush3.bf16.msra.mxu1 %v419_v37 }
 0x162   :  { %422 = vmatprep.subr.bf16.mxu1 %v421_v40 }
 0x165   :  { %424 = vmatpush3.bf16.msra.mxu1 %v423_v43 }
 0x166   :  { %426 = vmatprep.subr.bf16.mxu1 %v425_v46 }
 0x169   :  { %428 = vmatpush3.bf16.msra.mxu1 %v427_v49 }
 0x233   :  { %v195_v57 = vpop.f32.mrb[0].mxu0 }
 0x234   :  { %v196_v58 = vadd.f32 %v195_v57, %v122_v55  ;;  %v197_v59 = vpop.f32.mrb[1].mxu0 }
 0x235   :  { %v198_v60 = vadd.f32 %v197_v59, %v126_v56 }
 0x236   :  { %v202_v61 = vmul.f32 0.70710677, %v196_v58  ;;  %v200_v5 = vmul.f32 0.5, %v196_v58 }
 0x237   :  { %v203_v62 = vmul.f32 0.70710677, %v198_v60  ;;  %v201_v3 = vmul.f32 0.5, %v198_v60 }
 0x238   :  { %438 = verf.f32 %v202_v61 }
 0x239   :  { %440 = verf.f32 %v203_v62 }
 0x242   :  { %v439_v63 = vpop.eup %438 }
 0x243   :  { %v441_v1 = vpop.eup %440  ;;  %v206_v2 = vadd.f32 1.0, %v439_v63 }
 0x244   :  { %v207_v4 = vadd.f32 1.0, %v441_v1 }
 0x245   :  { %v208_v7 = vmul.f32 %v206_v2, %v200_v5 }
 0x246   :  { %v209_v6 = vmul.f32 %v207_v4, %v201_v3 }
 0x248   :  { %313 = vmatprep.mubr.f32.mxu1 %v209_v6 }
 0x249   :  { %314 = vmatmul.mubr.f32.vlgmr.msra.gmra.mrb[0].mxu1 %v208_v7 }
 0x31c   :  { %v362_v8 = vpop.f32.mrb[0].mxu1 }
 0x31d   :  { %v363_v10 = vpop.f32.mrb[1].mxu1 }
 0x31e   :  { %v364_v11 = vadd.f32 %v363_v10, %v362_v8 }
 0x320   :  { %v316_v12 = vadd.f32 %v364_v11, %v329_v9 }
 0x322   :  { %v319_v13 = vadd.f32 %v316_v12, %v564_v0 }
 0x324   :  { %320 = vst [vmem:[%s598_s7] sm:$0x3] %v319_v13 }
 0x325   :  { %325 = vsyncpa [#allocation3], 1 }
 0x326   :  { %326 = vsyncpa [#allocation5], 1 }

</bundles_post_ra>
